<compile_context>
chip_gen: v7x
topology: tpu7x:2x2x1
jax: 0.10.0
libtpu: 0.0.40
codegen_flags: <defaults>
</compile_context>

<pallas_src>
import functools

import jax
import jax.numpy as jnp
from jax.experimental import pallas as pl
from jax.experimental.pallas import tpu as pltpu


# ---------------------------------------------------------------------------
# Stage 1: fused 1x1 conv + folded BN + ReLU (channel-major GEMM).
# ---------------------------------------------------------------------------
def _conv1x1_bn_relu_kernel(x_ref, w_ref, scale_ref, bias_ref, o_ref):
    # x_ref: (Cin, TL), w_ref: (Cout, Cin), scale/bias: (Cout, 1), o_ref: (Cout, TL)
    acc = jnp.dot(w_ref[...], x_ref[...], preferred_element_type=jnp.float32)
    y = acc * scale_ref[...] + bias_ref[...]
    o_ref[...] = jnp.maximum(y, 0.0).astype(o_ref.dtype)


def conv1x1_bn_relu(x_ncl, w_oc, scale, bias, *, tile_l=2048):
    """relu((w_oc @ x[n]) * scale + bias) per image.  x_ncl: (N, Cin, L)."""
    N, Cin, L = x_ncl.shape
    Cout = w_oc.shape[0]
    tl = min(tile_l, L)                       # big lane-dense spatial tile
    grid = (N, pl.cdiv(L, tl))                # partial last tile is masked
    scale2 = scale.reshape(Cout, 1).astype(jnp.float32)
    bias2 = bias.reshape(Cout, 1).astype(jnp.float32)
    return pl.pallas_call(
        _conv1x1_bn_relu_kernel,
        out_shape=jax.ShapeDtypeStruct((N, Cout, L), x_ncl.dtype),
        grid=grid,
        in_specs=[
            pl.BlockSpec((None, Cin, tl), lambda n, j: (n, 0, j)),
            pl.BlockSpec((Cout, Cin), lambda n, j: (0, 0)),
            pl.BlockSpec((Cout, 1), lambda n, j: (0, 0)),
            pl.BlockSpec((Cout, 1), lambda n, j: (0, 0)),
        ],
        out_specs=pl.BlockSpec((None, Cout, tl), lambda n, j: (n, 0, j)),
        compiler_params=pltpu.CompilerParams(
            dimension_semantics=("parallel", "parallel")),
    )(x_ncl, w_oc, scale2, bias2)


# ---------------------------------------------------------------------------
# Stage 2: fused kxk stride-2 conv + folded BN + ReLU.
#   Tap planes (built in JAX glue): planes[n, ph*k+kw, c, i*Wo+ow]
#       = padded_out1[n, c, 2*i+ph, 2*ow+kw]
#   Inside the kernel, tap (kh, kw) is the contiguous lane slice
#       planes[(kh%2)*k+kw][:, (kh//2)*Wo : (kh//2)*Wo + Ho*Wo]   -> (Cin, Ho*Wo)
# ---------------------------------------------------------------------------
def _make_conv2_kernel(k, Wo, Lo):
    def kernel(planes_ref, w_ref, scale_ref, bias_ref, o_ref):
        # planes_ref: (2k, Cin, Lp), w_ref: (k*k, Cout, Cin),
        # scale/bias: (Cout, 1), o_ref: (Cout, Lo)
        acc = jnp.zeros(o_ref.shape, jnp.float32)
        for kh in range(k):                      # fully static unroll (k*k dots)
            off = (kh // 2) * Wo
            for kw in range(k):
                p = (kh % 2) * k + kw
                wt = w_ref[kh * k + kw]                     # (Cout, Cin)
                xt = planes_ref[p, :, off:off + Lo]         # (Cin, Lo), static slice
                acc = acc + jnp.dot(wt, xt, preferred_element_type=jnp.float32)
        y = acc * scale_ref[...] + bias_ref[...]
        o_ref[...] = jnp.maximum(y, 0.0).astype(o_ref.dtype)
    return kernel


def conv_k_stride2_bn_relu(planes, w2t, scale, bias, *, k, Wo, Lo):
    """planes: (N, 2k, Cin, Lp), w2t: (k*k, Cout, Cin).  Returns (N, Cout, Lo)."""
    N, P, Cin, Lp = planes.shape
    Cout = w2t.shape[1]
    scale2 = scale.reshape(Cout, 1).astype(jnp.float32)
    bias2 = bias.reshape(Cout, 1).astype(jnp.float32)
    return pl.pallas_call(
        _make_conv2_kernel(k, Wo, Lo),
        out_shape=jax.ShapeDtypeStruct((N, Cout, Lo), planes.dtype),
        grid=(N,),
        in_specs=[
            pl.BlockSpec((None, P, Cin, Lp), lambda n: (n, 0, 0, 0)),
            pl.BlockSpec((k * k, Cout, Cin), lambda n: (0, 0, 0)),
            pl.BlockSpec((Cout, 1), lambda n: (0, 0)),
            pl.BlockSpec((Cout, 1), lambda n: (0, 0)),
        ],
        out_specs=pl.BlockSpec((None, Cout, Lo), lambda n: (n, 0, 0)),
        compiler_params=pltpu.CompilerParams(dimension_semantics=("parallel",)),
    )(planes, w2t, scale2, bias2)


def _space_to_tap_planes(out1, k, pad, Ho, Wo, Hq):
    """Pad + partial space-to-depth: (N, C, H, W) -> (N, 2k, C, Hq*Wo)."""
    N, C, H, W = out1.shape
    need_h = 2 * Hq                 # max padded row accessed is ph + 2*(Hq-1)
    need_w = 2 * Wo + k - 2         # max padded col accessed is (k-1) + 2*(Wo-1)
    bh = max(pad, need_h - H - pad)
    bw = max(pad, need_w - W - pad)
    xp = jnp.pad(out1, ((0, 0), (0, 0), (pad, bh), (pad, bw)))
    planes = []
    for ph in range(2):
        for kw in range(k):
            planes.append(xp[:, :, ph:ph + 2 * Hq:2, kw:kw + 2 * Wo:2])  # (N,C,Hq,Wo)
    planes = jnp.stack(planes, axis=1)            # (N, 2k, C, Hq, Wo)
    return planes.reshape(N, 2 * k, C, Hq * Wo)


# ---------------------------------------------------------------------------
# Parameters / BN folding / forward
# ---------------------------------------------------------------------------
def init_params(key, in_planes, planes, kernel_size):
    ks = jax.random.split(key, 10)
    p = {}
    # conv1: 1x1, no bias -> stored (Cout, Cin)
    p["w1"] = 0.1 * jax.random.normal(ks[0], (planes, in_planes), jnp.float32)
    # conv2: kxk, no bias -> stored HWIO (k, k, Cin, Cout)
    p["w2"] = 0.1 * jax.random.normal(
        ks[1], (kernel_size, kernel_size, planes, planes), jnp.float32)
    p["bn1_gamma"] = 1.0 + 0.1 * jax.random.normal(ks[2], (planes,), jnp.float32)
    p["bn1_beta"] = 0.1 * jax.random.normal(ks[3], (planes,), jnp.float32)
    p["bn1_mean"] = 0.05 * jax.random.normal(ks[4], (planes,), jnp.float32)
    p["bn1_var"] = 1.0 + 0.1 * jnp.abs(jax.random.normal(ks[5], (planes,), jnp.float32))
    p["bn2_gamma"] = 1.0 + 0.1 * jax.random.normal(ks[6], (planes,), jnp.float32)
    p["bn2_beta"] = 0.1 * jax.random.normal(ks[7], (planes,), jnp.float32)
    p["bn2_mean"] = 0.05 * jax.random.normal(ks[8], (planes,), jnp.float32)
    p["bn2_var"] = 1.0 + 0.1 * jnp.abs(jax.random.normal(ks[9], (planes,), jnp.float32))
    return p


def _bn_fold(gamma, beta, mean, var, eps=1e-5):
    scale = gamma / jnp.sqrt(var + eps)
    bias = beta - mean * scale
    return scale, bias


@functools.partial(jax.jit, static_argnames=("kernel_size",))
def block_bais_forward(x_nchw, params, kernel_size):
    """Forward of Block_bais.  Input/output are NCHW (PyTorch convention)."""
    N, Cin, H, W = x_nchw.shape
    k = kernel_size
    pad = (k - 1) // 2
    planes = params["w1"].shape[0]

    # --- stage 1: conv1 (1x1) + bn1 + relu, channel-major fused Pallas GEMM ---
    s1, b1 = _bn_fold(params["bn1_gamma"], params["bn1_beta"],
                      params["bn1_mean"], params["bn1_var"])
    out1 = conv1x1_bn_relu(x_nchw.reshape(N, Cin, H * W), params["w1"], s1, b1)
    out1 = out1.reshape(N, planes, H, W)

    # --- stage 2: conv2 (kxk, stride 2, pad (k-1)//2) + bn2 + relu ---
    Ho = (H + 2 * pad - k) // 2 + 1
    Wo = (W + 2 * pad - k) // 2 + 1
    Hq = Ho + pad
    Lo = Ho * Wo
    planes_arr = _space_to_tap_planes(out1, k, pad, Ho, Wo, Hq)
    # HWIO (kh, kw, ci, co) -> (k*k, Cout, Cin), tap index t = kh*k + kw
    w2t = jnp.transpose(params["w2"], (0, 1, 3, 2)).reshape(k * k, planes, planes)
    s2, b2 = _bn_fold(params["bn2_gamma"], params["bn2_beta"],
                      params["bn2_mean"], params["bn2_var"])
    out2 = conv_k_stride2_bn_relu(planes_arr, w2t, s2, b2, k=k, Wo=Wo, Lo=Lo)
    return out2.reshape(N, planes, Ho, Wo)        # already NCHW, no transpose


# ---------------------------------------------------------------------------
# Pure-JAX reference (lax.conv) for correctness checking.
# ---------------------------------------------------------------------------
def _reference_forward(x_nchw, params, kernel_size):
    k = kernel_size
    pad = (k - 1) // 2
    Cout1, Cin = params["w1"].shape
    w1 = params["w1"].reshape(Cout1, Cin, 1, 1)          # OIHW
    w2 = jnp.transpose(params["w2"], (3, 2, 0, 1))       # HWIO -> OIHW
    s1, b1 = _bn_fold(params["bn1_gamma"], params["bn1_beta"],
                      params["bn1_mean"], params["bn1_var"])
    s2, b2 = _bn_fold(params["bn2_gamma"], params["bn2_beta"],
                      params["bn2_mean"], params["bn2_var"])
    dn1 = jax.lax.conv_dimension_numbers(x_nchw.shape, w1.shape, ("NCHW", "OIHW", "NCHW"))
    o = jax.lax.conv_general_dilated(x_nchw, w1, (1, 1), "VALID", dimension_numbers=dn1)
    o = jnp.maximum(o * s1[None, :, None, None] + b1[None, :, None, None], 0.0)
    dn2 = jax.lax.conv_dimension_numbers(o.shape, w2.shape, ("NCHW", "OIHW", "NCHW"))
    o = jax.lax.conv_general_dilated(
        o, w2, (2, 2), [(pad, pad), (pad, pad)], dimension_numbers=dn2)
    o = jnp.maximum(o * s2[None, :, None, None] + b2[None, :, None, None], 0.0)
    return o


if __name__ == "__main__":
    in_planes, planes, kernel_size = 4, 8, 3
    N, H, W = 2, 16, 16

    key = jax.random.PRNGKey(0)
    kx, kp = jax.random.split(key)
    x = jax.random.normal(kx, (N, in_planes, H, W), jnp.float32)
    params = init_params(kp, in_planes, planes, kernel_size)

    out = block_bais_forward(x, params, kernel_size)
    out = jax.block_until_ready(out)

    assert out.shape == (N, planes, H // 2, W // 2), out.shape

    ref = jax.block_until_ready(_reference_forward(x, params, kernel_size))
    assert jnp.allclose(out, ref, atol=2e-3, rtol=2e-3), float(jnp.max(jnp.abs(out - ref)))

    print("KERNEL_OK")
</pallas_src>

<mosaic_0001>
module attributes {stable_mosaic.version = 11 : i64} {
  func.func @_conv1x1_bn_relu_kernel(%arg0: i32, %arg1: i32, %arg2: memref<1x4x256xf32, #tpu.memory_space<vmem>>, %arg3: memref<8x4xf32, #tpu.memory_space<vmem>>, %arg4: memref<8x1xf32, #tpu.memory_space<vmem>>, %arg5: memref<8x1xf32, #tpu.memory_space<vmem>>, %arg6: memref<1x8x256xf32, #tpu.memory_space<vmem>>) attributes {dimension_semantics = [#tpu.dimension_semantics<parallel>, #tpu.dimension_semantics<parallel>], iteration_bounds = array<i64: 2, 1>, scalar_prefetch = 0 : i64, scratch_operands = 0 : i64, tpu.core_type = #tpu.core_type<tc>, window_params = [{transform_indices = @transform_0, window_bounds = array<i64: 1, 4, 256>}, {pipeline_mode = #tpu.pipeline_mode<synchronous>, transform_indices = @transform_1, window_bounds = array<i64: 8, 4>}, {pipeline_mode = #tpu.pipeline_mode<synchronous>, transform_indices = @transform_2, window_bounds = array<i64: 8, 1>}, {pipeline_mode = #tpu.pipeline_mode<synchronous>, transform_indices = @transform_3, window_bounds = array<i64: 8, 1>}, {transform_indices = @transform_4, window_bounds = array<i64: 1, 8, 256>}]} {
    %c0 = arith.constant 0 : index
    %c0_0 = arith.constant 0 : index
    %0 = vector.load %arg3[%c0, %c0_0] : memref<8x4xf32, #tpu.memory_space<vmem>>, vector<8x4xf32>
    %c0_1 = arith.constant 0 : index
    %c0_2 = arith.constant 0 : index
    %c0_3 = arith.constant 0 : index
    %1 = vector.load %arg2[%c0_1, %c0_2, %c0_3] : memref<1x4x256xf32, #tpu.memory_space<vmem>>, vector<1x4x256xf32>
    %2 = vector.shape_cast %1 : vector<1x4x256xf32> to vector<4x256xf32>
    %cst = arith.constant dense<0.000000e+00> : vector<8x256xf32>
    %3 = tpu.matmul %0, %2, %cst {dimension_numbers = #tpu.dot_dimension_numbers<[1], [0], [0], [1], [0, 0, 1, 1], [], []>} : vector<8x4xf32>, vector<4x256xf32>, vector<8x256xf32> -> vector<8x256xf32>
    %c0_4 = arith.constant 0 : index
    %c0_5 = arith.constant 0 : index
    %4 = vector.load %arg4[%c0_4, %c0_5] : memref<8x1xf32, #tpu.memory_space<vmem>>, vector<8x1xf32>
    %5 = vector.broadcast %4 : vector<8x1xf32> to vector<8x256xf32>
    %6 = arith.mulf %3, %5 : vector<8x256xf32>
    %c0_6 = arith.constant 0 : index
    %c0_7 = arith.constant 0 : index
    %7 = vector.load %arg5[%c0_6, %c0_7] : memref<8x1xf32, #tpu.memory_space<vmem>>, vector<8x1xf32>
    %8 = vector.broadcast %7 : vector<8x1xf32> to vector<8x256xf32>
    %9 = arith.addf %6, %8 : vector<8x256xf32>
    %cst_8 = arith.constant 0.000000e+00 : f32
    %10 = vector.broadcast %cst_8 : f32 to vector<8x256xf32>
    %11 = arith.maximumf %9, %10 : vector<8x256xf32>
    %c0_9 = arith.constant 0 : index
    %c0_10 = arith.constant 0 : index
    %c0_11 = arith.constant 0 : index
    %12 = vector.load %arg6[%c0_9, %c0_10, %c0_11] : memref<1x8x256xf32, #tpu.memory_space<vmem>>, vector<1x8x256xf32>
    %13 = vector.shape_cast %12 : vector<1x8x256xf32> to vector<8x256xf32>
    %14 = vector.shape_cast %11 : vector<8x256xf32> to vector<1x8x256xf32>
    tpu.vector_store %arg6[%c0_9, %c0_10, %c0_11], %14 {strides = array<i32>} : memref<1x8x256xf32, #tpu.memory_space<vmem>>, vector<1x8x256xf32>,
    return
  }
  func.func @transform_0(%arg0: i32, %arg1: i32) -> (i32, i32, i32) {
    %c0_i32 = arith.constant 0 : i32
    %c0_i32_0 = arith.constant 0 : i32
    return %arg0, %c0_i32, %arg1 : i32, i32, i32
  }
  func.func @transform_1(%arg0: i32, %arg1: i32) -> (i32, i32) {
    %c0_i32 = arith.constant 0 : i32
    %c0_i32_0 = arith.constant 0 : i32
    %c0_i32_1 = arith.constant 0 : i32
    return %c0_i32, %c0_i32_0 : i32, i32
  }
  func.func @transform_2(%arg0: i32, %arg1: i32) -> (i32, i32) {
    %c0_i32 = arith.constant 0 : i32
    %c0_i32_0 = arith.constant 0 : i32
    %c0_i32_1 = arith.constant 0 : i32
    return %c0_i32, %c0_i32_0 : i32, i32
  }
  func.func @transform_3(%arg0: i32, %arg1: i32) -> (i32, i32) {
    %c0_i32 = arith.constant 0 : i32
    %c0_i32_0 = arith.constant 0 : i32
    %c0_i32_1 = arith.constant 0 : i32
    return %c0_i32, %c0_i32_0 : i32, i32
  }
  func.func @transform_4(%arg0: i32, %arg1: i32) -> (i32, i32, i32) {
    %c0_i32 = arith.constant 0 : i32
    %c0_i32_0 = arith.constant 0 : i32
    return %arg0, %c0_i32, %arg1 : i32, i32, i32
  }
}

module attributes {stable_mosaic.version = 11 : i64} {
  func.func @kernel(%arg0: i32, %arg1: memref<1x6x8x72xf32, #tpu.memory_space<vmem>>, %arg2: memref<9x8x8xf32, #tpu.memory_space<vmem>>, %arg3: memref<8x1xf32, #tpu.memory_space<vmem>>, %arg4: memref<8x1xf32, #tpu.memory_space<vmem>>, %arg5: memref<1x8x64xf32, #tpu.memory_space<vmem>>) attributes {dimension_semantics = [#tpu.dimension_semantics<parallel>], iteration_bounds = array<i64: 2>, scalar_prefetch = 0 : i64, scratch_operands = 0 : i64, tpu.core_type = #tpu.core_type<tc>, window_params = [{transform_indices = @transform_0, window_bounds = array<i64: 1, 6, 8, 72>}, {pipeline_mode = #tpu.pipeline_mode<synchronous>, transform_indices = @transform_1, window_bounds = array<i64: 9, 8, 8>}, {pipeline_mode = #tpu.pipeline_mode<synchronous>, transform_indices = @transform_2, window_bounds = array<i64: 8, 1>}, {pipeline_mode = #tpu.pipeline_mode<synchronous>, transform_indices = @transform_3, window_bounds = array<i64: 8, 1>}, {transform_indices = @transform_4, window_bounds = array<i64: 1, 8, 64>}]} {
    %cst = arith.constant 0.000000e+00 : f32
    %0 = vector.broadcast %cst : f32 to vector<8x64xf32>
    %c0 = arith.constant 0 : index
    %c0_0 = arith.constant 0 : index
    %c0_1 = arith.constant 0 : index
    %1 = vector.load %arg2[%c0, %c0_0, %c0_1] : memref<9x8x8xf32, #tpu.memory_space<vmem>>, vector<1x8x8xf32>
    %2 = vector.shape_cast %1 : vector<1x8x8xf32> to vector<8x8xf32>
    %c0_2 = arith.constant 0 : index
    %c0_3 = arith.constant 0 : index
    %c0_4 = arith.constant 0 : index
    %c0_5 = arith.constant 0 : index
    %3 = vector.load %arg1[%c0_2, %c0_3, %c0_4, %c0_5] : memref<1x6x8x72xf32, #tpu.memory_space<vmem>>, vector<1x1x8x64xf32>
    %4 = vector.shape_cast %3 : vector<1x1x8x64xf32> to vector<8x64xf32>
    %cst_6 = arith.constant dense<0.000000e+00> : vector<8x64xf32>
    %5 = tpu.matmul %2, %4, %cst_6 {dimension_numbers = #tpu.dot_dimension_numbers<[1], [0], [0], [1], [0, 0, 1, 1], [], []>} : vector<8x8xf32>, vector<8x64xf32>, vector<8x64xf32> -> vector<8x64xf32>
    %6 = arith.addf %0, %5 : vector<8x64xf32>
    %c1 = arith.constant 1 : index
    %c0_7 = arith.constant 0 : index
    %c0_8 = arith.constant 0 : index
    %7 = vector.load %arg2[%c1, %c0_7, %c0_8] : memref<9x8x8xf32, #tpu.memory_space<vmem>>, vector<1x8x8xf32>
    %8 = vector.shape_cast %7 : vector<1x8x8xf32> to vector<8x8xf32>
    %c0_9 = arith.constant 0 : index
    %c1_10 = arith.constant 1 : index
    %c0_11 = arith.constant 0 : index
    %c0_12 = arith.constant 0 : index
    %9 = vector.load %arg1[%c0_9, %c1_10, %c0_11, %c0_12] : memref<1x6x8x72xf32, #tpu.memory_space<vmem>>, vector<1x1x8x64xf32>
    %10 = vector.shape_cast %9 : vector<1x1x8x64xf32> to vector<8x64xf32>
    %cst_13 = arith.constant dense<0.000000e+00> : vector<8x64xf32>
    %11 = tpu.matmul %8, %10, %cst_13 {dimension_numbers = #tpu.dot_dimension_numbers<[1], [0], [0], [1], [0, 0, 1, 1], [], []>} : vector<8x8xf32>, vector<8x64xf32>, vector<8x64xf32> -> vector<8x64xf32>
    %12 = arith.addf %6, %11 : vector<8x64xf32>
    %c2 = arith.constant 2 : index
    %c0_14 = arith.constant 0 : index
    %c0_15 = arith.constant 0 : index
    %13 = vector.load %arg2[%c2, %c0_14, %c0_15] : memref<9x8x8xf32, #tpu.memory_space<vmem>>, vector<1x8x8xf32>
    %14 = vector.shape_cast %13 : vector<1x8x8xf32> to vector<8x8xf32>
    %c0_16 = arith.constant 0 : index
    %c2_17 = arith.constant 2 : index
    %c0_18 = arith.constant 0 : index
    %c0_19 = arith.constant 0 : index
    %15 = vector.load %arg1[%c0_16, %c2_17, %c0_18, %c0_19] : memref<1x6x8x72xf32, #tpu.memory_space<vmem>>, vector<1x1x8x64xf32>
    %16 = vector.shape_cast %15 : vector<1x1x8x64xf32> to vector<8x64xf32>
    %cst_20 = arith.constant dense<0.000000e+00> : vector<8x64xf32>
    %17 = tpu.matmul %14, %16, %cst_20 {dimension_numbers = #tpu.dot_dimension_numbers<[1], [0], [0], [1], [0, 0, 1, 1], [], []>} : vector<8x8xf32>, vector<8x64xf32>, vector<8x64xf32> -> vector<8x64xf32>
    %18 = arith.addf %12, %17 : vector<8x64xf32>
    %c3 = arith.constant 3 : index
    %c0_21 = arith.constant 0 : index
    %c0_22 = arith.constant 0 : index
    %19 = vector.load %arg2[%c3, %c0_21, %c0_22] : memref<9x8x8xf32, #tpu.memory_space<vmem>>, vector<1x8x8xf32>
    %20 = vector.shape_cast %19 : vector<1x8x8xf32> to vector<8x8xf32>
    %c0_23 = arith.constant 0 : index
    %c3_24 = arith.constant 3 : index
    %c0_25 = arith.constant 0 : index
    %c0_26 = arith.constant 0 : index
    %21 = vector.load %arg1[%c0_23, %c3_24, %c0_25, %c0_26] : memref<1x6x8x72xf32, #tpu.memory_space<vmem>>, vector<1x1x8x64xf32>
    %22 = vector.shape_cast %21 : vector<1x1x8x64xf32> to vector<8x64xf32>
    %cst_27 = arith.constant dense<0.000000e+00> : vector<8x64xf32>
    %23 = tpu.matmul %20, %22, %cst_27 {dimension_numbers = #tpu.dot_dimension_numbers<[1], [0], [0], [1], [0, 0, 1, 1], [], []>} : vector<8x8xf32>, vector<8x64xf32>, vector<8x64xf32> -> vector<8x64xf32>
    %24 = arith.addf %18, %23 : vector<8x64xf32>
    %c4 = arith.constant 4 : index
    %c0_28 = arith.constant 0 : index
    %c0_29 = arith.constant 0 : index
    %25 = vector.load %arg2[%c4, %c0_28, %c0_29] : memref<9x8x8xf32, #tpu.memory_space<vmem>>, vector<1x8x8xf32>
    %26 = vector.shape_cast %25 : vector<1x8x8xf32> to vector<8x8xf32>
    %c0_30 = arith.constant 0 : index
    %c4_31 = arith.constant 4 : index
    %c0_32 = arith.constant 0 : index
    %c0_33 = arith.constant 0 : index
    %27 = vector.load %arg1[%c0_30, %c4_31, %c0_32, %c0_33] : memref<1x6x8x72xf32, #tpu.memory_space<vmem>>, vector<1x1x8x64xf32>
    %28 = vector.shape_cast %27 : vector<1x1x8x64xf32> to vector<8x64xf32>
    %cst_34 = arith.constant dense<0.000000e+00> : vector<8x64xf32>
    %29 = tpu.matmul %26, %28, %cst_34 {dimension_numbers = #tpu.dot_dimension_numbers<[1], [0], [0], [1], [0, 0, 1, 1], [], []>} : vector<8x8xf32>, vector<8x64xf32>, vector<8x64xf32> -> vector<8x64xf32>
    %30 = arith.addf %24, %29 : vector<8x64xf32>
    %c5 = arith.constant 5 : index
    %c0_35 = arith.constant 0 : index
    %c0_36 = arith.constant 0 : index
    %31 = vector.load %arg2[%c5, %c0_35, %c0_36] : memref<9x8x8xf32, #tpu.memory_space<vmem>>, vector<1x8x8xf32>
    %32 = vector.shape_cast %31 : vector<1x8x8xf32> to vector<8x8xf32>
    %c0_37 = arith.constant 0 : index
    %c5_38 = arith.constant 5 : index
    %c0_39 = arith.constant 0 : index
    %c0_40 = arith.constant 0 : index
    %33 = vector.load %arg1[%c0_37, %c5_38, %c0_39, %c0_40] : memref<1x6x8x72xf32, #tpu.memory_space<vmem>>, vector<1x1x8x64xf32>
    %34 = vector.shape_cast %33 : vector<1x1x8x64xf32> to vector<8x64xf32>
    %cst_41 = arith.constant dense<0.000000e+00> : vector<8x64xf32>
    %35 = tpu.matmul %32, %34, %cst_41 {dimension_numbers = #tpu.dot_dimension_numbers<[1], [0], [0], [1], [0, 0, 1, 1], [], []>} : vector<8x8xf32>, vector<8x64xf32>, vector<8x64xf32> -> vector<8x64xf32>
    %36 = arith.addf %30, %35 : vector<8x64xf32>
    %c6 = arith.constant 6 : index
    %c0_42 = arith.constant 0 : index
    %c0_43 = arith.constant 0 : index
    %37 = vector.load %arg2[%c6, %c0_42, %c0_43] : memref<9x8x8xf32, #tpu.memory_space<vmem>>, vector<1x8x8xf32>
    %38 = vector.shape_cast %37 : vector<1x8x8xf32> to vector<8x8xf32>
    %c0_44 = arith.constant 0 : index
    %c0_45 = arith.constant 0 : index
    %c0_46 = arith.constant 0 : index
    %c8 = arith.constant 8 : index
    %39 = vector.load %arg1[%c0_44, %c0_45, %c0_46, %c8] : memref<1x6x8x72xf32, #tpu.memory_space<vmem>>, vector<1x1x8x64xf32>
    %40 = vector.shape_cast %39 : vector<1x1x8x64xf32> to vector<8x64xf32>
    %cst_47 = arith.constant dense<0.000000e+00> : vector<8x64xf32>
    %41 = tpu.matmul %38, %40, %cst_47 {dimension_numbers = #tpu.dot_dimension_numbers<[1], [0], [0], [1], [0, 0, 1, 1], [], []>} : vector<8x8xf32>, vector<8x64xf32>, vector<8x64xf32> -> vector<8x64xf32>
    %42 = arith.addf %36, %41 : vector<8x64xf32>
    %c7 = arith.constant 7 : index
    %c0_48 = arith.constant 0 : index
    %c0_49 = arith.constant 0 : index
    %43 = vector.load %arg2[%c7, %c0_48, %c0_49] : memref<9x8x8xf32, #tpu.memory_space<vmem>>, vector<1x8x8xf32>
    %44 = vector.shape_cast %43 : vector<1x8x8xf32> to vector<8x8xf32>
    %c0_50 = arith.constant 0 : index
    %c1_51 = arith.constant 1 : index
    %c0_52 = arith.constant 0 : index
    %c8_53 = arith.constant 8 : index
    %45 = vector.load %arg1[%c0_50, %c1_51, %c0_52, %c8_53] : memref<1x6x8x72xf32, #tpu.memory_space<vmem>>, vector<1x1x8x64xf32>
    %46 = vector.shape_cast %45 : vector<1x1x8x64xf32> to vector<8x64xf32>
    %cst_54 = arith.constant dense<0.000000e+00> : vector<8x64xf32>
    %47 = tpu.matmul %44, %46, %cst_54 {dimension_numbers = #tpu.dot_dimension_numbers<[1], [0], [0], [1], [0, 0, 1, 1], [], []>} : vector<8x8xf32>, vector<8x64xf32>, vector<8x64xf32> -> vector<8x64xf32>
    %48 = arith.addf %42, %47 : vector<8x64xf32>
    %c8_55 = arith.constant 8 : index
    %c0_56 = arith.constant 0 : index
    %c0_57 = arith.constant 0 : index
    %49 = vector.load %arg2[%c8_55, %c0_56, %c0_57] : memref<9x8x8xf32, #tpu.memory_space<vmem>>, vector<1x8x8xf32>
    %50 = vector.shape_cast %49 : vector<1x8x8xf32> to vector<8x8xf32>
    %c0_58 = arith.constant 0 : index
    %c2_59 = arith.constant 2 : index
    %c0_60 = arith.constant 0 : index
    %c8_61 = arith.constant 8 : index
    %51 = vector.load %arg1[%c0_58, %c2_59, %c0_60, %c8_61] : memref<1x6x8x72xf32, #tpu.memory_space<vmem>>, vector<1x1x8x64xf32>
    %52 = vector.shape_cast %51 : vector<1x1x8x64xf32> to vector<8x64xf32>
    %cst_62 = arith.constant dense<0.000000e+00> : vector<8x64xf32>
    %53 = tpu.matmul %50, %52, %cst_62 {dimension_numbers = #tpu.dot_dimension_numbers<[1], [0], [0], [1], [0, 0, 1, 1], [], []>} : vector<8x8xf32>, vector<8x64xf32>, vector<8x64xf32> -> vector<8x64xf32>
    %54 = arith.addf %48, %53 : vector<8x64xf32>
    %c0_63 = arith.constant 0 : index
    %c0_64 = arith.constant 0 : index
    %55 = vector.load %arg3[%c0_63, %c0_64] : memref<8x1xf32, #tpu.memory_space<vmem>>, vector<8x1xf32>
    %56 = vector.broadcast %55 : vector<8x1xf32> to vector<8x64xf32>
    %57 = arith.mulf %54, %56 : vector<8x64xf32>
    %c0_65 = arith.constant 0 : index
    %c0_66 = arith.constant 0 : index
    %58 = vector.load %arg4[%c0_65, %c0_66] : memref<8x1xf32, #tpu.memory_space<vmem>>, vector<8x1xf32>
    %59 = vector.broadcast %58 : vector<8x1xf32> to vector<8x64xf32>
    %60 = arith.addf %57, %59 : vector<8x64xf32>
    %cst_67 = arith.constant 0.000000e+00 : f32
    %61 = vector.broadcast %cst_67 : f32 to vector<8x64xf32>
    %62 = arith.maximumf %60, %61 : vector<8x64xf32>
    %c0_68 = arith.constant 0 : index
    %c0_69 = arith.constant 0 : index
    %c0_70 = arith.constant 0 : index
    %63 = vector.load %arg5[%c0_68, %c0_69, %c0_70] : memref<1x8x64xf32, #tpu.memory_space<vmem>>, vector<1x8x64xf32>
    %64 = vector.shape_cast %63 : vector<1x8x64xf32> to vector<8x64xf32>
    %65 = vector.shape_cast %62 : vector<8x64xf32> to vector<1x8x64xf32>
    tpu.vector_store %arg5[%c0_68, %c0_69, %c0_70], %65 {strides = array<i32>} : memref<1x8x64xf32, #tpu.memory_space<vmem>>, vector<1x8x64xf32>,
    return
  }
  func.func @transform_0(%arg0: i32) -> (i32, i32, i32, i32) {
    %c0_i32 = arith.constant 0 : i32
    %c0_i32_0 = arith.constant 0 : i32
    %c0_i32_1 = arith.constant 0 : i32
    %c0_i32_2 = arith.constant 0 : i32
    return %arg0, %c0_i32, %c0_i32_0, %c0_i32_1 : i32, i32, i32, i32
  }
  func.func @transform_1(%arg0: i32) -> (i32, i32, i32) {
    %c0_i32 = arith.constant 0 : i32
    %c0_i32_0 = arith.constant 0 : i32
    %c0_i32_1 = arith.constant 0 : i32
    %c0_i32_2 = arith.constant 0 : i32
    return %c0_i32, %c0_i32_0, %c0_i32_1 : i32, i32, i32
  }
  func.func @transform_2(%arg0: i32) -> (i32, i32) {
    %c0_i32 = arith.constant 0 : i32
    %c0_i32_0 = arith.constant 0 : i32
    %c0_i32_1 = arith.constant 0 : i32
    return %c0_i32, %c0_i32_0 : i32, i32
  }
  func.func @transform_3(%arg0: i32) -> (i32, i32) {
    %c0_i32 = arith.constant 0 : i32
    %c0_i32_0 = arith.constant 0 : i32
    %c0_i32_1 = arith.constant 0 : i32
    return %c0_i32, %c0_i32_0 : i32, i32
  }
  func.func @transform_4(%arg0: i32) -> (i32, i32, i32) {
    %c0_i32 = arith.constant 0 : i32
    %c0_i32_0 = arith.constant 0 : i32
    %c0_i32_1 = arith.constant 0 : i32
    return %arg0, %c0_i32, %c0_i32_0 : i32, i32, i32
  }
}

</mosaic_0001>

<bundles_post_ra>
// kernel: block_bais_forward.2
= control target key start
LH: loop header
LB: loop body
LE: loop exit
PB: predicated region body
PF: predicated region fallthrough
CT: control target
= control target key end

     0   :  { %s523_s15 = smov 0   ;;  %s525_s16 = smov 0   ;;  %s565_s0 = inlined_call_operand.vmem [shape: f32[2,4,256], index: 0, kind: input, shape index: {}]   ;;  %s566_s1 = inlined_call_operand.vmem [shape: f32[8,4], index: 1, kind: input, shape index: {}]   ;;  %s567_s2 = inlined_call_operand.vmem [shape: f32[8,1], index: 2, kind: input, shape index: {}]   ;;  %s568_s3 = inlined_call_operand.vmem [shape: f32[8,1], index: 3, kind: input, shape index: {}]   ;;  %s569_s4 = inlined_call_operand.vmem [shape: f32[2,8,256], index: 4, kind: output, shape index: {}]  }
   0x1   :  { %s527_s17 = smov 0  }
   0x2 LB: > { %s26_s18 = sadd.s32 1, %s490_s16  ;;  %p432_p0 = scmp.ge.s32.totalorder %s494_s17, 1  ;;  %s494_s17 = sphi %s527_s17, %s14_s17   ;;  %s490_s16 = sphi %s525_s16, %s571_s16   ;;  %s486_s15 = sphi %s523_s15, %s570_s15  }
   0x3   : > { %p28_p1 = scmp.ge.s32.totalorder %s26_s18, 2  ;;  %p183_p2 = scmp.lt.s32.totalorder %s494_s17, 3 }
   0x5   : > { %s573_s18 = smov (%p28_p1, %s26_s18), 0  ;;  %p184_p3 = pnand %p432_p0, %p183_p2 }
   0x6   : > { %p218_p4 = scmp.lt.s32.totalorder (!%p184_p3), %s486_s15, 1  ;;  %v496_v0 = vmov (!%p184_p3), 0.0   ;;  %v497_v1 = vmov (!%p184_p3), 0   ;;  %v321_v2 = vld [vmem:[%s567_s2] sm:$0xff] (!%p184_p3)  ;;  %vm245_vm0 = vcmask (!%p184_p3), 1043456   ;;  %vm241_vm1 = vcmask (!%p184_p3), 31744  }
   0x7   : > { %187 = sbr.rel (%p184_p3) target bundleno = 242 (0xf2), region = 36  ;;  %314 = vmatprep.mubr.f32.mxu0 (!%p184_p3), %v496_v0  ;;  %470 = vset.pattern.permute.xlu0 (!%p184_p3), %v497_v1  ;;  %v329_v3 = vld [vmem:[%s568_s3] sm:$0xff] (!%p184_p3) }
   0x8   : > { %324 = vperm.xlu0 (!%p184_p3), %470, %v321_v2   ;;  %v237_v6 = vld [vmem:[%s566_s1] sm:$0xff] (!%p184_p3) }
   0xc   : > { %332 = vperm.xlu0 (!%p184_p3), %470, %v329_v3  }
   0xe   : > { %s575_s15 = smov (!%p218_p4, %s486_s15), 1 }
   0xf   : > { %s442_s23 = sshll.u32 %s575_s15, 3  ;;  %s443_s29 = sshll.u32 %s575_s15, 4 }
  0x10   : > { %s225_s26 = scalar_lea.vmem %s565_s0, %s442_s23  ;;  %s235_s6 = scalar_lea.vmem %s569_s4, %s443_s29 }
  0x11   : > { %v238_v4 = vld [vmem:[%s225_s26] sm:$0xff] }
  0x12   : > { %v240_v5 = vcombine.high %v238_v4, %v238_v4 }
  0x14   : > { %437 = vmatprep.subr.msk.mxu0 %vm245_vm0, %v240_v5 }
  0x15   : > { %438 = vmatpush1.msk.msra.mxu0 %vm245_vm0, %v238_v4 }
  0x16   : > { %439 = vmatmul.mubr.msk.f32.vlgmr.msra.gmra.mrb[0].mxu0 %vm241_vm1, %v237_v6 }
  0x87   : > { %v325_v7 = vpop.permute.xlu0 %324 }
  0x8b   : > { %v333_v11 = vpop.permute.xlu0 %332 }
  0xe9   : > { %v316_v8 = vpop.f32.mrb[0].mxu0 }
  0xea   : > { %v327_v9 = vmul.f32 %v325_v7, %v316_v8  ;;  %v318_v10 = vpop.f32.mrb[1].mxu0 }
  0xeb   : > { %v328_v12 = vmul.f32 %v325_v7, %v318_v10 }
  0xec   : > { %v335_v13 = vadd.f32 %v333_v11, %v327_v9 }
  0xed   : > { %v336_v14 = vadd.f32 %v333_v11, %v328_v12 }
  0xee   : > { %v337_v15 = vmax.f32 %v335_v13, 0.0 }
  0xef   : > { %v338_v16 = vmax.f32 %v336_v14, 0.0 }
  0xf0   : > { %339 = vst [vmem:[%s235_s6] sm:$0xff] %v337_v15 }
  0xf1   : > { %340 = vst [vmem:[%s235_s6 + $0x8] sm:$0xff] %v338_v16 }
  0xf2 PF: > { %s14_s17 = sadd.s32 1, %s494_s17   ;;  %s570_s15 = smov %s490_s16 }
  0xf3   : > { %p11_p5 = scmp.ge.s32.totalorder %s14_s17, 4   ;;  %s571_s16 = smov %s573_s18 }
  0xf5   :  { %13 = sbr.rel (!%p11_p5) target bundleno = 2 (0x2), region = 66 }

// kernel: block_bais_forward.3
= control target key start
LH: loop header
LB: loop body
LE: loop exit
PB: predicated region body
PF: predicated region fallthrough
CT: control target
= control target key end

     0   :  { %s1132_s15 = smov 0   ;;  %s1230_s0 = inlined_call_operand.vmem [shape: f32[2,6,8,72], index: 0, kind: input, shape index: {}]   ;;  %s1231_s1 = inlined_call_operand.vmem [shape: f32[9,8,8], index: 1, kind: input, shape index: {}]   ;;  %s1232_s2 = inlined_call_operand.vmem [shape: f32[8,1], index: 2, kind: input, shape index: {}]   ;;  %s1233_s3 = inlined_call_operand.vmem [shape: f32[8,1], index: 3, kind: input, shape index: {}]   ;;  %s1234_s4 = inlined_call_operand.vmem [shape: f32[2,8,64], index: 4, kind: output, shape index: {}]  }
   0x1 LB: > { %s971_s16 = sadd.s32 4294967295, %s1101_s15   ;;  %p975_p0 = scmp.ge.s32.totalorder %s1101_s15, 1  ;;  %s1101_s15 = sphi %s1132_s15, %s14_s15  }
   0x2   : > { %p162_p1 = scmp.lt.s32.totalorder %s1101_s15, 3 }
   0x4   : > { %p163_p2 = pnand %p975_p0, %p162_p1 }
   0x5   : > { %p187_p3 = scmp.lt.s32.totalorder (!%p163_p2), %s971_s16, 1  ;;  %v1103_v0 = vmov (!%p163_p2), 0.0   ;;  %vm1104_vm0 = vmmov (!%p163_p2), 0   ;;  %v978_v3 = vld [vmem:[%s1231_s1 + $0x8] sm:$0xff] (!%p163_p2)  ;;  %vm202_vm1 = vcmask (!%p163_p2), 64512   ;;  %s1105_s23 = smov (!%p163_p2), 120  }
   0x6   : > { %166 = sbr.rel (%p163_p2) target bundleno = 371 (0x173), region = 36  ;;  %1020 = vmatprep.subr.mxu1 (!%p163_p2), %v1103_v0  ;;  %1022 = vmatprep.mubr.msk.f32.mxu1 (!%p163_p2), %vm1104_vm0, %v1103_v0  ;;  %v988_v6 = vld [vmem:[%s1231_s1 + $0x20] sm:$0xff] (!%p163_p2)  ;;  %v1106_v11 = vmov (!%p163_p2), 0   ;;  %v991_v12 = vld [vmem:[%s1231_s1 + $0x28] sm:$0xff] (!%p163_p2)  ;;  %v982_v13 = vld [vmem:[%s1231_s1 + $0x10] sm:$0xff] (!%p163_p2)  ;;  %vm916_vm2 = vcmask (!%p163_p2), 523264  }
   0x7   : > { %1040 = vmatprep.subr.mxu0 (!%p163_p2), %v1103_v0  ;;  %1042 = vmatprep.mubr.msk.f32.mxu0 (!%p163_p2), %vm1104_vm0, %v1103_v0  ;;  %v901_v8 = vld [vmem:[%s1232_s2] sm:$0xff] (!%p163_p2)  ;;  %v985_v15 = vld [vmem:[%s1231_s1 + $0x18] sm:$0xff] (!%p163_p2)  ;;  %v994_v16 = vld [vmem:[%s1231_s1 + $0x30] sm:$0xff] (!%p163_p2) }
   0x8   : > { %v908_v9 = vld [vmem:[%s1233_s3] sm:$0xff] (!%p163_p2)  ;;  %1093 = vset.pattern.permute.xlu1 (!%p163_p2), %v1106_v11  ;;  %1094 = vset.pattern.permute.xlu0 (!%p163_p2), %v1106_v11  ;;  %v996_v19 = vld [vmem:[%s1231_s1 + $0x38] sm:$0xff] (!%p163_p2) }
   0x9   : > { %v196_v10 = vld [vmem:[%s1231_s1] sm:$0xff] (!%p163_p2) }
   0xa   : > { %v998_v21 = vld [vmem:[%s1231_s1 + $0x40] sm:$0xff] (!%p163_p2) }
   0xd   : > { %s1236_s16 = smov (!%p187_p3, %s971_s16), 1 }
   0xe   : > { %s1080_s17 = smul.u32 48, %s1236_s16 }
  0x10   : > { %s1152_s20 = scalar_lea.vmem %s1230_s0, %s1080_s17 }
  0x11   : > { %v197_v1 = vld [vmem:[%s1152_s20] sm:$0xff]  ;;  %v983_v2 = vld [vmem:[%s1152_s20 + $0x10] sm:$0xff]  ;;  %v979_v4 = vld [vmem:[%s1152_s20 + $0x8] sm:$0xff] }
  0x12   : > { %664 = vrot.lane.b32.xlu0 %v197_v1, %s1105_s23  ;;  %824 = vrot.lane.b32.xlu1 %v983_v2, %s1105_s23  ;;  %v989_v5 = vld [vmem:[%s1152_s20 + $0x20] sm:$0xff]  ;;  %v992_v7 = vld [vmem:[%s1152_s20 + $0x28] sm:$0xff] }
  0x13   : > { %1021 = vmatpush3.msra.mxu1 %v979_v4  ;;  %1041 = vmatpush3.msra.mxu0 %v989_v5  ;;  %v986_v14 = vld [vmem:[%s1152_s20 + $0x18] sm:$0xff]  ;;  %s977_s20 = sshll.u32 %s1236_s16, 3 }
  0x14   : > { %1023 = vmatmul.mubr.msk.f32.vlgmr.msra.gmra.mrb[0].mxu1 %vm202_vm1, %v978_v3  ;;  %1025 = vmatprep.subr.mxu1 %v1103_v0 }
  0x15   : > { %1026 = vmatpush3.msra.mxu1 %v197_v1  ;;  %1027 = vmatprep.mubr.msk.f32.mxu1 %vm1104_vm0, %v1103_v0 }
  0x16   : > { %744 = vrot.lane.b32.xlu0 %v979_v4, %s1105_s23  ;;  %1043 = vmatmul.mubr.msk.f32.vlgmr.msra.gmra.mrb[0].mxu0 %vm202_vm1, %v988_v6  ;;  %s195_s23 = scalar_lea.vmem %s1234_s4, %s977_s20 }
  0x17   : > { %1030 = vmatprep.subr.mxu1 %v1103_v0  ;;  %1045 = vmatprep.subr.mxu0 %v1103_v0 }
  0x18   : > { %1046 = vmatpush3.msra.mxu0 %v992_v7  ;;  %1047 = vmatprep.mubr.msk.f32.mxu0 %vm1104_vm0, %v1103_v0 }
  0x19   : > { %1050 = vmatprep.subr.mxu0 %v1103_v0  ;;  %904 = vperm.xlu1 %1093, %v901_v8  }
  0x1a   : > { %911 = vperm.xlu0 %1094, %v908_v9  }
  0x1c   : > { %1028 = vmatmul.mubr.msk.f32.vlgmr.msra.gmra.mrb[0].mxu1 %vm202_vm1, %v196_v10 }
  0x1d   : > { %1031 = vmatpush3.msra.mxu1 %v983_v2  ;;  %1032 = vmatprep.mubr.msk.f32.mxu1 %vm1104_vm0, %v1103_v0 }
  0x1e   : > { %1048 = vmatmul.mubr.msk.f32.vlgmr.msra.gmra.mrb[0].mxu0 %vm202_vm1, %v991_v12  ;;  %1035 = vmatprep.subr.mxu1 %v1103_v0 }
  0x1f   : > { %1052 = vmatprep.mubr.msk.f32.mxu0 %vm1104_vm0, %v1103_v0 }
  0x24   : > { %1033 = vmatmul.mubr.msk.f32.vlgmr.msra.gmra.mrb[0].mxu1 %vm202_vm1, %v982_v13 }
  0x25   : > { %1036 = vmatpush3.msra.mxu1 %v986_v14  ;;  %1037 = vmatprep.mubr.msk.f32.mxu1 %vm1104_vm0, %v1103_v0 }
  0x2c   : > { %1038 = vmatmul.mubr.msk.f32.vlgmr.msra.gmra.mrb[0].mxu1 %vm202_vm1, %v985_v15 }
  0x84   : > { %v665_v17 = vpop.permute.xlu0 %664  ;;  %v825_v20 = vpop.permute.xlu1 %824 }
  0x85   : > { %1051 = vmatpush3.msra.mxu0 %v665_v17 }
  0x86   : > { %1053 = vmatmul.mubr.msk.f32.vlgmr.msra.gmra.mrb[0].mxu0 %vm202_vm1, %v994_v16  ;;  %1055 = vmatprep.subr.mxu0 %v1103_v0 }
  0x87   : > { %1057 = vmatprep.mubr.msk.f32.mxu0 %vm1104_vm0, %v1103_v0 }
  0x88   : > { %v745_v18 = vpop.permute.xlu0 %744 }
  0x89   : > { %1056 = vmatpush3.msra.mxu0 %v745_v18 }
  0x8a   : > { %1060 = vmatprep.subr.mxu0 %v1103_v0 }
  0x8e   : > { %1058 = vmatmul.mubr.msk.f32.vlgmr.msra.gmra.mrb[0].mxu0 %vm202_vm1, %v996_v19 }
  0x8f   : > { %1061 = vmatpush3.msra.mxu0 %v825_v20  ;;  %1062 = vmatprep.mubr.msk.f32.mxu0 %vm1104_vm0, %v1103_v0 }
  0x96   : > { %1063 = vmatmul.mubr.msk.f32.vlgmr.msra.gmra.mrb[0].mxu0 %vm202_vm1, %v998_v21 }
  0x98   : > { %v905_v25 = vpop.permute.xlu1 %904 }
  0x99   : > { %v912_v28 = vpop.permute.xlu0 %911 }
  0xff   : > { %v500_v22 = vpop.f32.mrb[0].mxu1 }
 0x100   : > { %v1039_v23 = vpop.f32.mrb[1].mxu1 }
 0x169   : > { %v896_v24 = vpop.f32.mrb[0].mxu0 }
 0x16a   : > { %v1065_v26 = vadd.f32 %v896_v24, %v500_v22  ;;  %v1064_v27 = vpop.f32.mrb[1].mxu0 }
 0x16c   : > { %v907_v29 = vmul.f32 %v1065_v26, %v905_v25 }
 0x16e   : > { %v914_v30 = vadd.f32 %v912_v28, %v907_v29 }
 0x170   : > { %v915_v31 = vmax.f32 %v914_v30, 0.0 }
 0x172   : > { %917 = vst.msk [vmem:[%s195_s23] sm:$0xff] %vm916_vm2, %v915_v31 }
 0x173 PF: > { %s14_s15 = sadd.s32 1, %s1101_s15  }
 0x174   : > { %p11_p4 = scmp.ge.s32.totalorder %s14_s15, 4  }
 0x176   :  { %13 = sbr.rel (!%p11_p4) target bundleno = 1 (0x1), region = 79 }

</bundles_post_ra>
